<compile_context>
chip_gen: v6e
topology: v6e:2x2x1
jax: 0.10.0
libtpu: 0.0.40
codegen_flags: <defaults>
</compile_context>

<pallas_src>
import functools

import jax
import jax.numpy as jnp
from jax.experimental import pallas as pl
from jax.experimental.pallas import tpu as pltpu


def _vmem_capacity_bytes():
    try:
        return int(pltpu.get_tpu_info().vmem_capacity_bytes)
    except Exception:
        return 64 * 1024 * 1024  # conservative fallback (v7x-sized)


_VMEM_CAP = _vmem_capacity_bytes()
_VMEM_LIMIT = (_VMEM_CAP * 3) // 4            # leave headroom for Mosaic scratch
_TM_PREF = 512 if _VMEM_CAP >= 100 * 1024 * 1024 else 256  # v5e/v6e vs v7x


def _pick_tile(dim, preferred, align):
    """Largest `align`-multiple divisor of `dim` <= `preferred`, else full dim."""
    # TODO(synk): unaligned dims fall back to the full extent (fine at these
    # shapes; very large unaligned dims would need a cdiv grid + masking).
    if dim <= preferred or dim % align != 0:
        return dim
    t = (preferred // align) * align
    while t >= align:
        if dim % t == 0:
            return t
        t -= align
    return dim


# ---------------------------------------------------------------------------
# Kernel 1: fused K/V/Q projections  (y_p = x_p @ Wt_p + b_p, p in {k,v,q})
#   x3 / wt3 are bf16 streams; f32 accumulator; bf16 output.
# ---------------------------------------------------------------------------
def _qkv_kernel(x_ref, wt_ref, b_ref, o_ref, acc_ref):
    # grid = (p, i, j, k); p = projection index, k = reduction step (last).
    @pl.when(pl.program_id(3) == 0)
    def _():
        acc_ref[...] = jnp.zeros_like(acc_ref)

    acc_ref[...] += jnp.dot(
        x_ref[0], wt_ref[0], preferred_element_type=jnp.float32)

    @pl.when(pl.program_id(3) == pl.num_programs(3) - 1)
    def _():
        o_ref[0] = (acc_ref[...] + b_ref[0]).astype(o_ref.dtype)


def qkv_projection(x3, wt3, b3):
    """x3: (3, M, K) bf16 stacked inputs; wt3: (3, K, N) bf16 pre-transposed;
    b3: (3, 1, N) f32. Returns (3, M, N) bf16."""
    _, M, K = x3.shape
    N = wt3.shape[2]
    tm = _pick_tile(M, _TM_PREF, 8)
    tn = _pick_tile(N, 256, 128)
    tk = _pick_tile(K, 512, 128)
    flops = 2 * 3 * M * K * N
    bytes_accessed = 2 * (3 * M * K + 3 * K * N + 3 * M * N) + 4 * 3 * N
    return pl.pallas_call(
        _qkv_kernel,
        out_shape=jax.ShapeDtypeStruct((3, M, N), jnp.bfloat16),
        grid=(3, M // tm, N // tn, K // tk),
        in_specs=[
            pl.BlockSpec((1, tm, tk), lambda p, i, j, k: (p, i, k)),
            pl.BlockSpec((1, tk, tn), lambda p, i, j, k: (p, k, j)),
            pl.BlockSpec((1, 1, tn), lambda p, i, j, k: (p, 0, j)),
        ],
        out_specs=pl.BlockSpec((1, tm, tn), lambda p, i, j, k: (p, i, j)),
        scratch_shapes=[pltpu.VMEM((tm, tn), jnp.float32)],
        compiler_params=pltpu.CompilerParams(
            dimension_semantics=("parallel", "parallel", "parallel", "arbitrary"),
            vmem_limit_bytes=_VMEM_LIMIT,
        ),
        cost_estimate=pl.CostEstimate(
            flops=flops, transcendentals=0, bytes_accessed=bytes_accessed),
    )(x3, wt3, b3)


# ---------------------------------------------------------------------------
# Kernel 2: scaled dot-product attention, a group of heads per grid step
#   scores = (q*scale) @ k^T ; attn = softmax(scores, dim=-1) ; ctx = attn @ v
# ---------------------------------------------------------------------------
def _attention_kernel(q_ref, k_ref, v_ref, ctx_ref, attn_ref, *, scale):
    # Fold scale into the (G,S,d) q tile: O(S*d) instead of O(S*S).
    q = (q_ref[...].astype(jnp.float32) * scale).astype(jnp.bfloat16)
    # q @ k^T per head: contract last dims, batch over heads (no transpose).
    s = jax.lax.dot_general(
        q, k_ref[...], (((2,), (2,)), ((0,), (0,))),
        preferred_element_type=jnp.float32)
    # Single live (g,S,S) f32 temporary: reuse `s` for the exponentials.
    s = jnp.exp(s - jnp.max(s, axis=-1, keepdims=True))
    # Exact reciprocal so the returned probabilities sum to 1 per row.
    inv = 1.0 / jnp.sum(s, axis=-1, keepdims=True)
    p = s * inv
    attn_ref[...] = p.astype(attn_ref.dtype)
    ctx_ref[...] = jax.lax.dot_general(
        p.astype(jnp.bfloat16), v_ref[...], (((2,), (1,)), ((0,), (0,))),
        preferred_element_type=jnp.float32).astype(ctx_ref.dtype)


def _pick_head_group(bh, s, d):
    """Heads per grid step, sized against the real VMEM budget.

    Footprint per head (bytes):
      bf16 q/k/v/ctx (4*S*d*2) and bf16 attn block (S*S*2), each x2 for
      double buffering, plus ~2 live (S,S) f32 temporaries in the body.
    """
    per_head = 2 * 2 * (4 * s * d + s * s) + 2 * 4 * s * s
    budget = max(_VMEM_LIMIT // 3, 1)
    g = max(1, min(bh, budget // max(per_head, 1)))
    # Keep >=2 grid steps for megacore, ideally >=4 for pipelining.
    if bh >= 4:
        g = min(g, max(1, bh // 4))
    elif bh >= 2:
        g = min(g, max(1, bh // 2))
    while bh % g != 0:
        g -= 1
    return g


def dot_product_attention(q, k, v, scale):
    """q/k/v: (B*H, S, d) bf16. Returns (ctx, attn) both bf16."""
    bh, s, d = q.shape
    g = _pick_head_group(bh, s, d)
    kernel = functools.partial(_attention_kernel, scale=scale)
    flops = 4 * bh * s * s * d  # two batched matmuls, 2 flops per MAC
    bytes_accessed = 2 * (4 * bh * s * d + bh * s * s)
    # TODO(synk): for long S (>~1-2K, esp. v7x 64 MiB VMEM) switch to a
    # KV-tiled online-softmax (flash) variant; the reference returns the full
    # (S,S) probability matrix, so the materialized path is kept here.
    # TODO(synk): when d < 128, a lane-dense 2-D (B*H, S*d) ctx out_spec would
    # avoid masked partial-lane stores; kept 3-D until the in-kernel reshape
    # is verified relayout-free.
    return pl.pallas_call(
        kernel,
        out_shape=(
            jax.ShapeDtypeStruct((bh, s, d), jnp.bfloat16),
            jax.ShapeDtypeStruct((bh, s, s), jnp.bfloat16),
        ),
        grid=(bh // g,),
        in_specs=[
            pl.BlockSpec((g, s, d), lambda i: (i, 0, 0)),
            pl.BlockSpec((g, s, d), lambda i: (i, 0, 0)),
            pl.BlockSpec((g, s, d), lambda i: (i, 0, 0)),
        ],
        out_specs=(
            pl.BlockSpec((g, s, d), lambda i: (i, 0, 0)),
            pl.BlockSpec((g, s, s), lambda i: (i, 0, 0)),
        ),
        compiler_params=pltpu.CompilerParams(
            dimension_semantics=("parallel",),
            vmem_limit_bytes=_VMEM_LIMIT,
        ),
        cost_estimate=pl.CostEstimate(
            flops=flops, transcendentals=bh * s * s, bytes_accessed=bytes_accessed),
    )(q, k, v)


# ---------------------------------------------------------------------------
# Kernel 3: fused final linear + residual add + LayerNorm (tiled over rows & K)
#   ctx / weights bf16; f32 accumulator; residual/LN math and output in f32.
# ---------------------------------------------------------------------------
def _final_kernel(ctx_ref, wt_ref, b_ref, res_ref, g_ref, beta_ref, o_ref,
                  acc_ref, *, eps):
    @pl.when(pl.program_id(1) == 0)
    def _():
        acc_ref[...] = jnp.zeros_like(acc_ref)

    acc_ref[...] += jnp.dot(
        ctx_ref[...], wt_ref[...], preferred_element_type=jnp.float32)

    @pl.when(pl.program_id(1) == pl.num_programs(1) - 1)
    def _():
        h = acc_ref[...] + b_ref[...] + res_ref[...]
        mean = jnp.mean(h, axis=-1, keepdims=True)
        var = jnp.mean((h - mean) ** 2, axis=-1, keepdims=True)  # biased (torch LN)
        o_ref[...] = (
            (h - mean) * jax.lax.rsqrt(var + eps) * g_ref[...] + beta_ref[...]
        ).astype(o_ref.dtype)


def final_linear_residual_layernorm(ctx2d, wt, b, res2d, gamma, beta, eps=1e-5):
    """ctx2d: (M, K) bf16; wt: (K, D) bf16; b/res2d/gamma/beta f32."""
    M, K = ctx2d.shape
    D = wt.shape[1]
    tm = _pick_tile(M, _TM_PREF, 8)
    tk = _pick_tile(K, 512, 128)
    kernel = functools.partial(_final_kernel, eps=eps)
    flops = 2 * M * K * D + 6 * M * D
    bytes_accessed = 2 * (M * K + K * D) + 4 * (2 * M * D + 3 * D)
    return pl.pallas_call(
        kernel,
        out_shape=jax.ShapeDtypeStruct((M, D), jnp.float32),
        grid=(M // tm, K // tk),
        in_specs=[
            pl.BlockSpec((tm, tk), lambda i, k: (i, k)),
            pl.BlockSpec((tk, D), lambda i, k: (k, 0)),
            pl.BlockSpec((1, D), lambda i, k: (0, 0)),
            pl.BlockSpec((tm, D), lambda i, k: (i, 0)),
            pl.BlockSpec((1, D), lambda i, k: (0, 0)),
            pl.BlockSpec((1, D), lambda i, k: (0, 0)),
        ],
        out_specs=pl.BlockSpec((tm, D), lambda i, k: (i, 0)),
        scratch_shapes=[pltpu.VMEM((tm, D), jnp.float32)],
        compiler_params=pltpu.CompilerParams(
            dimension_semantics=("parallel", "arbitrary"),
            vmem_limit_bytes=_VMEM_LIMIT,
        ),
        cost_estimate=pl.CostEstimate(
            flops=flops, transcendentals=M, bytes_accessed=bytes_accessed),
    )(ctx2d, wt, b.reshape(1, D), res2d, gamma.reshape(1, D), beta.reshape(1, D))


# ---------------------------------------------------------------------------
# Parameter init (deterministic synthetic weights, PyTorch layout + kernel-ready)
# ---------------------------------------------------------------------------
def init_params(key, model_dim, num_heads):
    ks = jax.random.split(key, 8)
    lim = 1.0 / jnp.sqrt(model_dim)
    u = lambda k, shp: jax.random.uniform(k, shp, jnp.float32, -lim, lim)
    wk, wv, wq, wf = (u(ks[i], (model_dim, model_dim)) for i in (0, 2, 4, 6))
    bk, bv, bq, bf = (u(ks[i], (model_dim,)) for i in (1, 3, 5, 7))
    return {
        "num_heads": num_heads,
        # PyTorch (out_features, in_features) layout — used by the reference.
        "wk": wk, "bk": bk, "wv": wv, "bv": bv, "wq": wq, "bq": bq,
        "wf": wf, "bf": bf,
        "gamma": jnp.ones((model_dim,), jnp.float32),
        "beta": jnp.zeros((model_dim,), jnp.float32),
        # Kernel-ready: pre-transposed to (in, out) once, K/V/Q stacked once,
        # and pre-cast to bf16 so the kernels stream half the weight bytes.
        "wkvq_t": jnp.stack([wk.T, wv.T, wq.T]).astype(jnp.bfloat16),
        "bkvq": jnp.stack([bk, bv, bq]).reshape(3, 1, model_dim),
        "wf_t": wf.T.astype(jnp.bfloat16),
    }


# ---------------------------------------------------------------------------
# Full forward pass (glue in plain JAX, hot paths in Pallas kernels)
# ---------------------------------------------------------------------------
def multi_head_attention(params, key_in, value_in, query_in):
    B, S, D = query_in.shape
    H = params["num_heads"]
    d = D // H
    residual2d = query_in.reshape(B * S, D)

    # One fused pallas_call for the K/V/Q projections (bf16 activation stream).
    x3 = jnp.stack([key_in.reshape(B * S, D),
                    value_in.reshape(B * S, D),
                    query_in.reshape(B * S, D)]).astype(jnp.bfloat16)
    kvq = qkv_projection(x3, params["wkvq_t"], params["bkvq"])

    # torch .view(B*H, -1, d) on contiguous tensors == row-major reshape.
    k = kvq[0].reshape(B * H, -1, d)
    v = kvq[1].reshape(B * H, -1, d)
    q = kvq[2].reshape(B * H, -1, d)

    # reference quirk: scale = (key.size(-1) // num_heads) ** (-0.5)
    # (integer floor-division; requires dim_per_head >= num_heads).
    scale = float((d // H) ** (-0.5))

    context, attention = dot_product_attention(q, k, v, scale)

    context2d = context.reshape(B * S, D)  # == .view(B, -1, d*H), still bf16
    out2d = final_linear_residual_layernorm(
        context2d, params["wf_t"], params["bf"], residual2d,
        params["gamma"], params["beta"])
    return out2d.reshape(B, S, D), attention


# ---------------------------------------------------------------------------
# Pure-JAX f32 reference for numerical verification
# ---------------------------------------------------------------------------
def reference_forward(params, key_in, value_in, query_in):
    B, S, D = query_in.shape
    H = params["num_heads"]
    d = D // H
    residual = query_in
    lin = lambda x, w, b: x @ w.T + b
    k = lin(key_in, params["wk"], params["bk"]).reshape(B * H, -1, d)
    v = lin(value_in, params["wv"], params["bv"]).reshape(B * H, -1, d)
    q = lin(query_in, params["wq"], params["bq"]).reshape(B * H, -1, d)
    scale = float((d // H) ** (-0.5))
    s = jnp.einsum("bij,bkj->bik", q, k) * scale
    p = jax.nn.softmax(s, axis=2)
    ctx = jnp.einsum("bik,bkj->bij", p, v).reshape(B, S, D)
    out = lin(ctx, params["wf"], params["bf"]) + residual
    mean = jnp.mean(out, axis=-1, keepdims=True)
    var = jnp.mean((out - mean) ** 2, axis=-1, keepdims=True)
    out = (out - mean) / jnp.sqrt(var + 1e-5) * params["gamma"] + params["beta"]
    return out, p


if __name__ == "__main__":
    B, S, model_dim, num_heads = 2, 8, 32, 4  # dim_per_head = 8

    root = jax.random.PRNGKey(0)
    pkey, k1, k2, k3 = jax.random.split(root, 4)
    params = init_params(pkey, model_dim, num_heads)

    key_in = jax.random.normal(k1, (B, S, model_dim), jnp.float32)
    value_in = jax.random.normal(k2, (B, S, model_dim), jnp.float32)
    query_in = jax.random.normal(k3, (B, S, model_dim), jnp.float32)

    out, attn = multi_head_attention(params, key_in, value_in, query_in)
    out = jax.block_until_ready(out)
    attn = jax.block_until_ready(attn)

    ref_out, ref_attn = reference_forward(params, key_in, value_in, query_in)
    assert out.shape == (B, S, model_dim)
    assert attn.shape == (B * num_heads, S, S)
    # bf16 matmul operands / bf16 intermediates (f32 accumulate) -> loosened
    # tolerance vs the pure-f32 reference.
    assert jnp.allclose(out, ref_out, atol=5e-2, rtol=5e-2)
    assert jnp.allclose(attn.astype(jnp.float32), ref_attn, atol=5e-2, rtol=5e-2)

    print("KERNEL_OK")
</pallas_src>

<mosaic_0001>
module attributes {stable_mosaic.version = 11 : i64} {
  func.func @_qkv_kernel(%arg0: i32, %arg1: i32, %arg2: i32, %arg3: i32, %arg4: memref<1x16x32xbf16, #tpu.memory_space<vmem>>, %arg5: memref<1x32x32xbf16, #tpu.memory_space<vmem>>, %arg6: memref<1x1x32xf32, #tpu.memory_space<vmem>>, %arg7: memref<1x16x32xbf16, #tpu.memory_space<vmem>>, %arg8: memref<16x32xf32, #tpu.memory_space<vmem>>) attributes {dimension_semantics = [#tpu.dimension_semantics<parallel>, #tpu.dimension_semantics<parallel>, #tpu.dimension_semantics<parallel>, #tpu.dimension_semantics<arbitrary>], iteration_bounds = array<i64: 3, 1, 1, 1>, scalar_prefetch = 0 : i64, scratch_operands = 1 : i64, tpu.core_type = #tpu.core_type<tc>, window_params = [{transform_indices = @transform_0, window_bounds = array<i64: 1, 16, 32>}, {transform_indices = @transform_1, window_bounds = array<i64: 1, 32, 32>}, {transform_indices = @transform_2, window_bounds = array<i64: 1, 1, 32>}, {transform_indices = @transform_3, window_bounds = array<i64: 1, 16, 32>}]} {
    %c0_i32 = arith.constant 0 : i32
    %0 = arith.cmpi eq, %arg3, %c0_i32 : i32
    %1 = arith.extui %0 : i1 to i32
    %c0_i32_0 = arith.constant 0 : i32
    %2 = arith.cmpi ne, %1, %c0_i32_0 : i32
    scf.if %2 {
      %cst_12 = arith.constant 0.000000e+00 : f32
      %14 = vector.broadcast %cst_12 : f32 to vector<16x32xf32>
      %c0_13 = arith.constant 0 : index
      %c0_14 = arith.constant 0 : index
      %15 = vector.load %arg8[%c0_13, %c0_14] : memref<16x32xf32, #tpu.memory_space<vmem>>, vector<16x32xf32>
      tpu.vector_store %arg8[%c0_13, %c0_14], %14 {strides = array<i32>} : memref<16x32xf32, #tpu.memory_space<vmem>>, vector<16x32xf32>,
    } else {
    }
    %c0 = arith.constant 0 : index
    %c0_1 = arith.constant 0 : index
    %3 = vector.load %arg8[%c0, %c0_1] : memref<16x32xf32, #tpu.memory_space<vmem>>, vector<16x32xf32>
    %c0_2 = arith.constant 0 : index
    %c0_3 = arith.constant 0 : index
    %c0_4 = arith.constant 0 : index
    %4 = vector.load %arg4[%c0_2, %c0_3, %c0_4] : memref<1x16x32xbf16, #tpu.memory_space<vmem>>, vector<1x16x32xbf16>
    %5 = vector.shape_cast %4 : vector<1x16x32xbf16> to vector<16x32xbf16>
    %c0_5 = arith.constant 0 : index
    %c0_6 = arith.constant 0 : index
    %c0_7 = arith.constant 0 : index
    %6 = vector.load %arg5[%c0_5, %c0_6, %c0_7] : memref<1x32x32xbf16, #tpu.memory_space<vmem>>, vector<1x32x32xbf16>
    %7 = vector.shape_cast %6 : vector<1x32x32xbf16> to vector<32x32xbf16>
    %cst = arith.constant dense<0.000000e+00> : vector<16x32xf32>
    %8 = tpu.matmul %5, %7, %cst {dimension_numbers = #tpu.dot_dimension_numbers<[1], [0], [0], [1], [0, 0, 1, 1], [], []>} : vector<16x32xbf16>, vector<32x32xbf16>, vector<16x32xf32> -> vector<16x32xf32>
    %9 = arith.addf %3, %8 : vector<16x32xf32>
    %c0_8 = arith.constant 0 : index
    %c0_9 = arith.constant 0 : index
    %10 = vector.load %arg8[%c0_8, %c0_9] : memref<16x32xf32, #tpu.memory_space<vmem>>, vector<16x32xf32>
    tpu.vector_store %arg8[%c0_8, %c0_9], %9 {strides = array<i32>} : memref<16x32xf32, #tpu.memory_space<vmem>>, vector<16x32xf32>,
    %c0_i32_10 = arith.constant 0 : i32
    %11 = arith.cmpi eq, %arg3, %c0_i32_10 : i32
    %12 = arith.extui %11 : i1 to i32
    %c0_i32_11 = arith.constant 0 : i32
    %13 = arith.cmpi ne, %12, %c0_i32_11 : i32
    scf.if %13 {
      %c0_12 = arith.constant 0 : index
      %c0_13 = arith.constant 0 : index
      %14 = vector.load %arg8[%c0_12, %c0_13] : memref<16x32xf32, #tpu.memory_space<vmem>>, vector<16x32xf32>
      %c0_14 = arith.constant 0 : index
      %c0_15 = arith.constant 0 : index
      %c0_16 = arith.constant 0 : index
      %15 = vector.load %arg6[%c0_14, %c0_15, %c0_16] : memref<1x1x32xf32, #tpu.memory_space<vmem>>, vector<1x1x32xf32>
      %16 = vector.shape_cast %15 : vector<1x1x32xf32> to vector<1x32xf32>
      %17 = vector.broadcast %16 : vector<1x32xf32> to vector<16x32xf32>
      %18 = arith.addf %14, %17 : vector<16x32xf32>
      %19 = arith.truncf %18 : vector<16x32xf32> to vector<16x32xbf16>
      %c0_17 = arith.constant 0 : index
      %c0_18 = arith.constant 0 : index
      %c0_19 = arith.constant 0 : index
      %20 = vector.load %arg7[%c0_17, %c0_18, %c0_19] : memref<1x16x32xbf16, #tpu.memory_space<vmem>>, vector<1x16x32xbf16>
      %21 = vector.shape_cast %20 : vector<1x16x32xbf16> to vector<16x32xbf16>
      %22 = vector.shape_cast %19 : vector<16x32xbf16> to vector<1x16x32xbf16>
      tpu.vector_store %arg7[%c0_17, %c0_18, %c0_19], %22 {strides = array<i32>} : memref<1x16x32xbf16, #tpu.memory_space<vmem>>, vector<1x16x32xbf16>,
    } else {
    }
    return
  }
  func.func @transform_0(%arg0: i32, %arg1: i32, %arg2: i32, %arg3: i32) -> (i32, i32, i32) {
    %c0_i32 = arith.constant 0 : i32
    return %arg0, %arg1, %arg3 : i32, i32, i32
  }
  func.func @transform_1(%arg0: i32, %arg1: i32, %arg2: i32, %arg3: i32) -> (i32, i32, i32) {
    %c0_i32 = arith.constant 0 : i32
    return %arg0, %arg3, %arg2 : i32, i32, i32
  }
  func.func @transform_2(%arg0: i32, %arg1: i32, %arg2: i32, %arg3: i32) -> (i32, i32, i32) {
    %c0_i32 = arith.constant 0 : i32
    %c0_i32_0 = arith.constant 0 : i32
    return %arg0, %c0_i32, %arg2 : i32, i32, i32
  }
  func.func @transform_3(%arg0: i32, %arg1: i32, %arg2: i32, %arg3: i32) -> (i32, i32, i32) {
    %c0_i32 = arith.constant 0 : i32
    return %arg0, %arg1, %arg2 : i32, i32, i32
  }
}

</mosaic_0001>

<bundles_post_ra>
// kernel: tpu_custom_call.1
= control target key start
LH: loop header
LB: loop body
LE: loop exit
PB: predicated region body
PF: predicated region fallthrough
CT: control target
= control target key end

     0   :  { %s1036_s0 = inlined_call_operand.hbm [shape: bf16[3,16,32], index: 0, kind: input, shape index: {}]   ;;  %s1037_s1 = inlined_call_operand.hbm [shape: bf16[3,32,32], index: 1, kind: input, shape index: {}]   ;;  %s1038_s2 = inlined_call_operand.vmem [shape: f32[3,1,32], index: 2, kind: input, shape index: {}]   ;;  %s1039_s3 = inlined_call_operand.hbm [shape: bf16[3,16,32], index: 3, kind: output, shape index: {}]  }
   0x1   :  { %1040 = sst [smem:[#allocation12_spill]] %s1036_s0 }
   0x2   :  { %8 = vsyncpa [#allocation4], 0 }
   0x3   :  { %10 = vsyncpa [#allocation4 + $0x1], 0 }
   0x4   :  { %11 = vsyncpa [#allocation7], 0 }
   0x5   :  { %13 = vsyncpa [#allocation7 + $0x1], 0 }
   0x6   :  { %14 = vsyncpa [#allocation5], 0 }
   0x7   :  { %16 = vsyncpa [#allocation5 + $0x1], 0  ;;  %s848_s12 = smov 0   ;;  %s850_s13 = smov 0  }
   0x8   :  { %s852_s14 = smov 0   ;;  %s854_s15 = smov 0  }
   0x9   :  { %s856_s16 = smov 0   ;;  %s858_s17 = smov 0  }
   0xa LB: > { %s559_s18 = sadd.s32 4294967295, %s817_s17   ;;  %s560_s19 = sadd.s32 4294967294, %s817_s17   ;;  %s817_s17 = sphi %s858_s17, %s22_s17   ;;  %s813_s16 = sphi %s856_s16, %s1052_s16   ;;  %s809_s15 = sphi %s854_s15, %s1051_s15   ;;  %s805_s14 = sphi %s852_s14, %s1050_s14   ;;  %s801_s13 = sphi %s850_s13, %s1049_s13   ;;  %s797_s12 = sphi %s848_s12, %s1048_s12  }
   0xb   : > { %s48_s20 = sadd.s32 1, %s813_s16  ;;  %s59_s21 = sadd.s32 1, %s805_s14 }
   0xc   : > { %p50_p0 = scmp.ge.s32.totalorder %s48_s20, 3  ;;  %p66_p1 = scmp.ne.s32.totalorder %s805_s14, %s801_s13 }
   0xd   : > { %p67_p2 = scmp.eq.s32.totalorder %s817_s17, 0  ;;  %p72_p3 = scmp.ne.s32.totalorder %s801_s13, %s797_s12 }
   0xe   : > { %s1054_s20 = smov (%p50_p0, %s48_s20), 0  ;;  %p73_p5 = scmp.eq.s32.totalorder %s559_s18, 0 }
   0xf   : > { %p889_p4 = por %p67_p2, %p66_p1  ;;  %s52_s23 = ssub.s32 %s813_s16, %s1054_s20 }
  0x10   : > { %p158_p6 = scmp.eq.s32.totalorder %s559_s18, 2  ;;  %p57_p7 = scmp.eq.s32.totalorder %s52_s23, 0 }
  0x11   : > { %p895_p8 = por %p73_p5, %p72_p3  ;;  %p164_p10 = scmp.eq.s32.totalorder %s560_s19, 2 }
  0x12   : > { %p899_p9 = por %p158_p6, %p66_p1  ;;  %p618_p12 = scmp.lt.s32.totalorder %s817_s17, 3 }
  0x13   : > { %s904_s26 = scalar_select %p57_p7, %s805_s14, %s59_s21  }
  0x14   : > { %p906_p11 = por %p164_p10, %p72_p3  ;;  %s912_s28 = sand.u32 1, %s805_s14  }
  0x15   : > { %s563_s29 = sshll.u32 %s912_s28, 3  ;;  %s585_s30 = sshll.u32 %s813_s16, 7 }
  0x16   : > { %s1045_s0 = sld [smem:[#allocation12_spill]]  ;;  %s188_s7 = scalar_lea.vmem [#allocation3], %s563_s29 }
  0x17   : > { %s198_s8 = sshll.u32 %s188_s7, 4  ;;  %p921_p13 = pnand %p618_p12, %p889_p4  ;;  %s199_s8 = int_to_ptr.vmem [resolvable:$true] %s198_s8 }
  0x18   : > { %p569_p0 = scmp.ge.s32.totalorder %s817_s17, 1  ;;  %s185_s10 = scalar_lea.sflag [#allocation4], %s912_s28 }
  0x19   : > { %p679_p1 = pneg %p921_p13  ;;  %s690_s11 = scalar_lea.vmem %s199_s8, 128 }
  0x1a   : > { %p691_p2 = scmp.ne.s32.totalorder %s199_s8, %s690_s11  ;;  %s819_s18 = smov [#allocation3]  }
  0x1b   : > { %s695_s19 = sshll.u32 %s819_s18, 4  ;;  %s696_s19 = int_to_ptr.vmem [resolvable:$false] %s695_s19 }
  0x1c   : > { %s197_s6 = scalar_lea.hbm %s1045_s0, %s585_s30  ;;  %p693_p3 = pnand %p691_p2, %p679_p1 }
  0x1d   : > { %s697_s21 = scalar_lea.vmem %s696_s19, 256  ;;  %p698_p4 = scmp.lt.s32.totalorder %s199_s8, %s696_s19 }
  0x1e   : > { %p694_p5 = pneg %p693_p3  ;;  %p699_p6 = scmp.lt.s32.totalorder %s697_s21, %s690_s11 }
  0x20   : > { %p700_p7 = por %p699_p6, %p698_p4 }
  0x22   : > { %p701_p10 = pnand %p700_p7, %p694_p5 }
  0x24   : > { %704 = shalt.err (!%p701_p10)
}
  0x25   : > { %s820_s22 = smov 64   ;;  %s821_s23 = smov 4  }
  0x26   : > { %610 = dma.hbm_to_vmem [thread:$0]  (!%p921_p13), %s197_s6, 128, %s199_s8, %s185_s10, %s820_s22, %s820_s22, %s821_s23  }
  0x27   : > { %p239_p12 = scmp.lt.s32.totalorder %s817_s17, 4  ;;  %s566_s29 = sshll.u32 %s912_s28, 4 }
  0x28   : > { %s586_s30 = sshll.u32 %s813_s16, 8  ;;  %s212_s18 = scalar_lea.vmem [#allocation6], %s566_s29 }
  0x29   : > { %p939_p2 = pnand %p569_p0, %p239_p12  ;;  %s221_s11 = scalar_lea.hbm %s1037_s1, %s586_s30 }
  0x2a   : > { %s222_s19 = sshll.u32 %s212_s18, 4  ;;  %s209_s21 = scalar_lea.sflag [#allocation7], %s912_s28  ;;  %s223_s19 = int_to_ptr.vmem [resolvable:$true] %s222_s19 }
  0x2b   : > { %s718_s0 = scalar_lea.vmem %s223_s19, 256  ;;  %s822_s6 = smov [#allocation6]  }
  0x2c   : > { %p719_p3 = scmp.ne.s32.totalorder %s223_s19, %s718_s0  ;;  %s723_s8 = sshll.u32 %s822_s6, 4  ;;  %s724_s8 = int_to_ptr.vmem [resolvable:$false] %s723_s8 }
  0x2d   : > { %s725_s10 = scalar_lea.vmem %s724_s8, 512  ;;  %p726_p0 = scmp.lt.s32.totalorder %s223_s19, %s724_s8 }
  0x2e   : > { %p721_p5 = pnand %p719_p3, %p679_p1  ;;  %p727_p6 = scmp.lt.s32.totalorder %s725_s10, %s718_s0 }
  0x30   : > { %p722_p4 = pneg %p721_p5  ;;  %p728_p7 = por %p727_p6, %p726_p0 }
  0x32   : > { %p729_p10 = pnand %p728_p7, %p722_p4 }
  0x34   : > { %732 = shalt.err (!%p729_p10)
}
  0x35   : > { %613 = dma.hbm_to_vmem [thread:$0]  (!%p921_p13), %s221_s11, 256, %s223_s19, %s209_s21, %s820_s22, %s820_s22, %s821_s23  }
  0x36   : > { %243 = sbr.rel (%p939_p2) target bundleno = 297 (0x129), region = 32  ;;  %s955_s28 = sand.u32 (!%p939_p2), 1, %s801_s13  }
  0x37   : > { %s570_s29 = sshll.u32 (!%p939_p2), %s955_s28, 3  ;;  %s246_s30 = scalar_lea.sflag (!%p939_p2), [#allocation4], %s955_s28 }
  0x38   : > { %s249_s0 = scalar_lea.vmem (!%p939_p2), [#allocation3], %s570_s29 }
  0x3b   : > { %784 = dma.done.wait (%p895_p8), %s246_s30, 128  }
  0x3c   : > { %786 = vsyncadd (%p895_p8), %s246_s30, 4294967168  ;;  %s571_s9 = sshll.u32 %s955_s28, 4  ;;  %s255_s22 = scalar_lea.sflag [#allocation7], %s955_s28 }
  0x3d   : > { %s258_s23 = scalar_lea.vmem [#allocation6], %s571_s9 }
  0x3e   : > { %788 = dma.done.wait (%p895_p8), %s255_s22, 256  }
  0x3f   : > { %790 = vsyncadd (%p895_p8), %s255_s22, 4294967040  ;;  %vm306_vm0 = vcmask 261120   ;;  %v823_v0 = vmov 0.0   ;;  %vm824_vm1 = vmmov 0   ;;  %v674_v1 = vld [vmem:[%s258_s23 + $0x8] sm:$0xff]   ;;  %v675_v2 = vld [vmem:[%s258_s23] sm:$0xff]  }
  0x40   : > { %593 = vmatprep.subr.bf16.mxu0 %v823_v0  ;;  %597 = vmatprep.mubr.msk.bf16.mxu0 %vm824_vm1, %v823_v0  ;;  %307 = vst.msk [vmem:[#allocation2] sm:$0xff] %vm306_vm0, %v823_v0  ;;  %308 = vst.msk [vmem:[#allocation2 + $0x8] sm:$0xff] %vm306_vm0, %v823_v0  ;;  %v676_v3 = vld [vmem:[%s249_s0] sm:$0xff]   ;;  %p294_p8 = scmp.lt.s32.totalorder %s809_s15, 2  ;;  %vm405_vm2 = vcmask 257024   ;;  %s589_s11 = sshll.u32 %s809_s15, 7 }
  0x41   : > { %594 = vmatpush3.bf16.msra.mxu0 %v674_v1  ;;  %s291_s18 = scalar_lea.vmem [#allocation8], %s570_s29  ;;  %s987_s8 = scalar_lea.hbm %s1039_s3, %s589_s11 }
  0x42   : > { %595 = vmatprep.subr.bf16.mxu0 %v823_v0  ;;  %s295_s24 = scalar_select %p294_p8, %s809_s15, 2 }
  0x43   : > { %s425_s19 = sshll.u32 %s291_s18, 4  ;;  %s409_s10 = scalar_lea.sflag [#allocation5], %s955_s28  ;;  %s989_s19 = int_to_ptr.vmem [resolvable:$true] %s425_s19 }
  0x44   : > { %s299_s7 = scalar_lea.vmem %s1038_s2, %s295_s24  ;;  %s733_s15 = scalar_lea.vmem %s989_s19, 128 }
  0x45   : > { %596 = vmatpush3.bf16.msra.mxu0 %v675_v2  ;;  %v577_v12 = vld [vmem:[%s299_s7] ss:$0 sm:$0xff]  ;;  %p734_p13 = scmp.ne.s32.totalorder %s989_s19, %s733_s15  ;;  %s825_s29 = smov [#allocation8]  }
  0x46   : > { %s737_s30 = sshll.u32 %s825_s29, 4  ;;  %s738_s30 = int_to_ptr.vmem [resolvable:$false] %s737_s30 }
  0x47   : > { %v309_v4 = vld [vmem:[#allocation2] sm:$0xff]  ;;  %v310_v8 = vld [vmem:[#allocation2 + $0x8] sm:$0xff]  ;;  %p735_p1 = pnand %p734_p13, %p899_p9  ;;  %s739_s0 = scalar_lea.vmem %s738_s30, 256 }
  0x48   : > { %598 = vmatmul.mubr.msk.bf16.vlgmr.msra.gmra.mxu0 %vm306_vm0, %v676_v3  ;;  %p740_p2 = scmp.lt.s32.totalorder %s989_s19, %s738_s30  ;;  %p741_p3 = scmp.lt.s32.totalorder %s739_s0, %s733_s15 }
  0x49   : > { %p736_p12 = pneg %p735_p1 }
  0x4a   : > { %p742_p5 = por %p741_p3, %p740_p2 }
  0x4c   : > { %p743_p4 = pnand %p742_p5, %p736_p12 }
 0x108   : > { %v372_v5 = vpop.f32.mrf.mxu0 }
 0x109   : > { %v379_v6 = vadd.f32 %v372_v5, %v309_v4 }
 0x10a   : > { %v599_v7 = vpop.f32.mrf.mxu0 }
 0x10b   : > { %381 = vst.msk [vmem:[#allocation2] sm:$0xff] %vm306_vm0, %v379_v6 }
 0x10c   : > { %v375_v9 = vpop.f32.mrf.mxu0 }
 0x10d   : > { %v380_v10 = vadd.f32 %v375_v9, %v310_v8 }
 0x10e   : > { %v600_v11 = vpop.f32.mrf.mxu0 }
 0x10f   : > { %382 = vst.msk [vmem:[#allocation2 + $0x8] sm:$0xff] %vm306_vm0, %v380_v10 }
 0x112   : > { %v386_v13 = vld [vmem:[#allocation2] sm:$0xff] }
 0x113   : > { %v395_v14 = vadd.f32 %v577_v12, %v386_v13 }
 0x115   : > { %v587_v15 = vpack.c.bf16 %v395_v14, %v395_v14 }
 0x116   : > { %v387_v16 = vld [vmem:[#allocation2 + $0x8] sm:$0xff] }
 0x117   : > { %v396_v17 = vadd.f32 %v577_v12, %v387_v16  ;;  %406 = vst.msk [vmem:[%s291_s18] sm:$0xf] %vm405_vm2, %v587_v15 }
 0x119   : > { %v588_v18 = vpack.c.bf16 %v396_v17, %v396_v17 }
 0x11b   : > { %407 = vst.msk [vmem:[%s291_s18 + $0x4] sm:$0xf] %vm405_vm2, %v588_v18 }
 0x11c   : > { %746 = shalt.err (!%p743_p4)
}
 0x11d   : > { %s747_s9 = scalar_lea.hbm %s987_s8, 128  ;;  %s751_s24 = scalar_lea.hbm %s1039_s3, 384 }
 0x11e   : > { %p748_p0 = scmp.ne.s32.totalorder %s987_s8, %s747_s9  ;;  %p752_p10 = scmp.lt.s32.totalorder %s987_s8, %s1039_s3 }
 0x11f   : > { %p753_p8 = scmp.lt.s32.totalorder %s751_s24, %s747_s9 }
 0x120   : > { %p749_p6 = pnand %p748_p0, %p899_p9 }
 0x121   : > { %p754_p13 = por %p753_p8, %p752_p10 }
 0x122   : > { %p750_p7 = pneg %p749_p6 }
 0x124   : > { %p755_p1 = pnand %p754_p13, %p750_p7 }
 0x126   : > { %758 = shalt.err (!%p755_p1)
}
 0x127   : > { %s826_s7 = smov 64   ;;  %s827_s11 = smov 4  }
 0x128   : > { %605 = dma.vmem_to_hbm [thread:$0]  (%p899_p9), %s989_s19, 128, %s987_s8, %s409_s10, %s826_s7, %s826_s7, %s827_s11  }
 0x129 PF: > { %p619_p12 = scmp.ge.s32.totalorder %s817_s17, 2  ;;  %s440_s18 = sand.u32 1, %s797_s12  }
 0x12a   : > { %s441_s21 = scalar_lea.sflag [#allocation5], %s440_s18 }
 0x12b   : > { %p615_p2 = pnand %p619_p12, %p906_p11 }
 0x12d   : > { %p616_p3 = pneg %p615_p2 }
 0x12f   : > { %792 = dma.done.wait (%p616_p3), %s441_s21, 128  }
 0x130   : > { %794 = vsyncadd (%p616_p3), %s441_s21, 4294967168  ;;  %s22_s17 = sadd.s32 1, %s817_s17   ;;  %s1048_s12 = smov %s801_s13 }
 0x131   : > { %p19_p5 = scmp.ge.s32.totalorder %s22_s17, 5   ;;  %s1049_s13 = smov %s805_s14 }
 0x132   : > { %s1050_s14 = smov %s904_s26  ;;  %s1051_s15 = smov %s813_s16 }
 0x133   : > { %s1052_s16 = smov %s1054_s20  ;;  %21 = sbr.rel (!%p19_p5) target bundleno = 10 (0xa), region = 101 }
 0x138   :  { %446 = vsyncpa [#allocation4], 1 }
 0x139   :  { %448 = vsyncpa [#allocation4 + $0x1], 1 }
 0x13a   :  { %449 = vsyncpa [#allocation7], 1 }
 0x13b   :  { %451 = vsyncpa [#allocation7 + $0x1], 1 }
 0x13c   :  { %452 = vsyncpa [#allocation5], 1 }
 0x13d   :  { %454 = vsyncpa [#allocation5 + $0x1], 1 }

</bundles_post_ra>
